<compile_context>
chip_gen: v5e
topology: v5e:2x2
jax: 0.10.0
libtpu: 0.0.40
codegen_flags: <defaults>
</compile_context>

<pallas_src>
import functools

import jax
import jax.numpy as jnp
from jax.experimental import pallas as pl
from jax.experimental.pallas import tpu as pltpu


def _round_up(x, m):
    return ((x + m - 1) // m) * m


def _cdiv(a, b):
    return -(-a // b)


def _pad_dim(d):
    # 256-granular (v6e/v7x MXU is 2x256x256) when the extra padding is cheap,
    # otherwise 128 (lane width / v5e MXU granularity).
    p256 = _round_up(d, 256)
    p128 = _round_up(d, 128)
    if p256 == p128 or (p256 - d) <= max(32, d // 8):
        return p256
    return p128


def _vmem_physical_bytes():
    try:
        return int(pltpu.get_tpu_info().vmem_capacity_bytes)
    except Exception:
        return 64 << 20  # conservative fallback: fits every generation


def _footprint_bytes(tm, ti, e_pad, x_bytes, w_bytes):
    # Double-buffered pipeline tiles + f32 accumulator scratch.
    acc = tm * e_pad * 4
    x_t = 2 * tm * e_pad * x_bytes
    o_t = 2 * tm * e_pad * x_bytes
    w1_t = 2 * e_pad * ti * w_bytes
    w2_t = 2 * ti * e_pad * w_bytes
    b_t = 2 * 8 * (ti + e_pad) * 4  # bias tiles, sublane-padded
    return acc + x_t + o_t + w1_t + w2_t + b_t


def _ffn_kernel(x_ref, w1_ref, b1_ref, w2_ref, b2_ref, o_ref, acc_ref,
                *, compute_dtype):
    # x_ref: (TM, E_pad), w1_ref: (E_pad, TI), b1_ref: (1, TI),
    # w2_ref: (TI, E_pad), b2_ref: (1, E_pad), o_ref/acc_ref: (TM, E_pad)
    ti = pl.program_id(1)

    @pl.when(ti == 0)
    def _():
        # Initialize the accumulator with the second bias.
        acc_ref[...] = jnp.broadcast_to(
            b2_ref[...].astype(jnp.float32), acc_ref.shape)

    # linear1 (this I-slab) + ReLU, f32 accumulation on the MXU.
    h = jnp.dot(x_ref[...].astype(compute_dtype), w1_ref[...],
                preferred_element_type=jnp.float32)
    h = jnp.maximum(h + b1_ref[...].astype(jnp.float32), 0.0)
    # TODO(synk): dropout with p>0 (training mode) would need pltpu.prng_*
    # masking; module default p=0 makes it the identity (eval semantics).

    # linear2 partial product for this I-slab, accumulated in f32.
    acc_ref[...] += jnp.dot(h.astype(compute_dtype), w2_ref[...],
                            preferred_element_type=jnp.float32)

    @pl.when(ti == pl.num_programs(1) - 1)
    def _():
        o_ref[...] = acc_ref[...].astype(o_ref.dtype)


def feed_forward(x, w1, b1, w2, b2, *, use_bf16=False, tm_max=512, ti_max=512):
    """x: (B, S, E). w1: (E, I), b1: (I,), w2: (I, E), b2: (E,).

    use_bf16=True casts x/W1/W2 to bfloat16 for the MXU (f32 accumulate):
    3-4x MXU throughput and half the weight HBM traffic, slightly different
    numerics than a pure-f32 reference.
    """
    B, S, E = x.shape
    I = w1.shape[1]
    M = B * S

    compute_dtype = jnp.bfloat16 if use_bf16 else x.dtype
    x_bytes = jnp.dtype(x.dtype).itemsize
    w_bytes = jnp.dtype(compute_dtype).itemsize

    E_pad = _pad_dim(E)
    I_pad = _pad_dim(I)
    align = 256 if I_pad % 256 == 0 else 128
    M8 = _round_up(M, 8)

    phys = _vmem_physical_bytes()
    budget = int(phys * 0.85)  # leave Mosaic internal-scratch headroom

    # --- Inner-dim tiling: keep weights fully resident when they fit. ---
    tm_probe = min(M8, 128)
    if _footprint_bytes(tm_probe, I_pad, E_pad, x_bytes, w_bytes) <= budget:
        TI, n_ti = I_pad, 1  # constant index_map -> weights DMA'd once per call
    else:
        TI = min(I_pad, _round_up(min(ti_max, I_pad), align))
        n_ti = _cdiv(I_pad, TI)
        TI = _round_up(_cdiv(I_pad, n_ti), align)
        n_ti = _cdiv(I_pad, TI)
        while TI > align and _footprint_bytes(tm_probe, TI, E_pad,
                                              x_bytes, w_bytes) > budget:
            TI = max(align, _round_up(TI // 2, align))
            n_ti = _cdiv(I_pad, TI)
    I_pad = n_ti * TI

    # --- Row tiling: TM is the arithmetic-intensity knob; as big as fits. ---
    TM = _round_up(min(tm_max, M8), 8)
    while TM > 8 and _footprint_bytes(TM, TI, E_pad, x_bytes, w_bytes) > budget:
        TM = _round_up(max(8, TM // 2), 8)
    # Megacore: keep >=2 blocks on the parallel M axis when it costs no extra
    # weight streaming (weights resident), so v7x's two TCs both get work.
    if n_ti == 1 and M8 > 8:
        TM = min(TM, _round_up(_cdiv(M8, 2), 8))
    M_pad = _round_up(M, TM)
    n_m = M_pad // TM

    # --- Host-side padding (skipped when already aligned). ---
    x2d = x.reshape(M, E)
    if (M_pad, E_pad) != (M, E):
        x2d = jnp.pad(x2d, ((0, M_pad - M), (0, E_pad - E)))
    w1c = w1.astype(compute_dtype)
    w2c = w2.astype(compute_dtype)
    if (E_pad, I_pad) != (E, I):
        w1c = jnp.pad(w1c, ((0, E_pad - E), (0, I_pad - I)))
        w2c = jnp.pad(w2c, ((0, I_pad - I), (0, E_pad - E)))
    b1p = b1.reshape(1, I)
    b2p = b2.reshape(1, E)
    if I_pad != I:
        b1p = jnp.pad(b1p, ((0, 0), (0, I_pad - I)))
    if E_pad != E:
        b2p = jnp.pad(b2p, ((0, 0), (0, E_pad - E)))

    # --- VMEM limit: never below the real footprint, capped near physical. ---
    fp = _footprint_bytes(TM, TI, E_pad, x_bytes, w_bytes)
    vmem_limit = int(min(int(phys * 0.95), max(fp + (4 << 20), 32 << 20)))

    w_passes = 1 if n_ti == 1 else n_m  # honest weight re-streaming count
    cost = pl.CostEstimate(
        flops=4 * M_pad * E_pad * I_pad,  # two matmuls, 2*M*E*I each
        transcendentals=0,
        bytes_accessed=(2 * M_pad * E_pad * x_bytes
                        + w_passes * 2 * E_pad * I_pad * w_bytes
                        + (I_pad + E_pad) * 4),
    )

    kernel = functools.partial(_ffn_kernel, compute_dtype=compute_dtype)

    out = pl.pallas_call(
        kernel,
        out_shape=jax.ShapeDtypeStruct((M_pad, E_pad), x.dtype),
        grid_spec=pltpu.PrefetchScalarGridSpec(
            num_scalar_prefetch=0,
            grid=(n_m, n_ti),
            in_specs=[
                pl.BlockSpec((TM, E_pad), lambda i, t: (i, 0)),   # x rows
                pl.BlockSpec((E_pad, TI), lambda i, t: (0, t)),   # W1 I-slab
                pl.BlockSpec((1, TI), lambda i, t: (0, t)),       # b1 I-slab
                pl.BlockSpec((TI, E_pad), lambda i, t: (t, 0)),   # W2 I-slab
                pl.BlockSpec((1, E_pad), lambda i, t: (0, 0)),    # b2
            ],
            out_specs=pl.BlockSpec((TM, E_pad), lambda i, t: (i, 0)),
            scratch_shapes=[pltpu.VMEM((TM, E_pad), jnp.float32)],
        ),
        compiler_params=pltpu.CompilerParams(
            dimension_semantics=("parallel", "arbitrary"),
            vmem_limit_bytes=vmem_limit,
        ),
        cost_estimate=cost,
    )(x2d, w1c, b1p, w2c, b2p)

    if (M_pad, E_pad) != (M, E):
        out = out[:M, :E]
    return out.reshape(B, S, E)


if __name__ == "__main__":
    # Small shapes implied by the module: (batch, seq, embed_size)
    batch, seq, embed_size = 2, 8, 32
    inner_size = embed_size  # module default when inner_size=None

    key = jax.random.PRNGKey(0)
    kx, kw1, kb1, kw2, kb2 = jax.random.split(key, 5)

    x = jax.random.normal(kx, (batch, seq, embed_size), dtype=jnp.float32)
    # Deterministic synthetic params (stored as (in, out) == PyTorch weight.T)
    w1 = jax.random.normal(kw1, (embed_size, inner_size), dtype=jnp.float32) * 0.1
    b1 = jax.random.normal(kb1, (inner_size,), dtype=jnp.float32) * 0.1
    w2 = jax.random.normal(kw2, (inner_size, embed_size), dtype=jnp.float32) * 0.1
    b2 = jax.random.normal(kb2, (embed_size,), dtype=jnp.float32) * 0.1

    # Reference in plain JAX (same math as the PyTorch forward, p=0 dropout)
    ref = jnp.maximum(x @ w1 + b1, 0.0) @ w2 + b2

    # Default f32 path: bit-for-tolerance match against the reference.
    y = feed_forward(x, w1, b1, w2, b2)
    jax.block_until_ready(y)
    assert jnp.allclose(y, ref, atol=1e-5, rtol=1e-5), "f32 mismatch vs reference"

    # Opt-in bf16 MXU path (flagged precision change; looser tolerance).
    y_bf16 = feed_forward(x, w1, b1, w2, b2, use_bf16=True)
    jax.block_until_ready(y_bf16)
    assert jnp.allclose(y_bf16, ref, atol=3e-2, rtol=3e-2), "bf16 mismatch vs reference"

    print("KERNEL_OK")
</pallas_src>

<mosaic_0001>
module attributes {stable_mosaic.version = 11 : i64} {
  func.func @_ffn_kernel(%arg0: i32, %arg1: i32, %arg2: memref<8x128xf32, #tpu.memory_space<vmem>>, %arg3: memref<128x128xf32, #tpu.memory_space<vmem>>, %arg4: memref<1x128xf32, #tpu.memory_space<vmem>>, %arg5: memref<128x128xf32, #tpu.memory_space<vmem>>, %arg6: memref<1x128xf32, #tpu.memory_space<vmem>>, %arg7: memref<8x128xf32, #tpu.memory_space<vmem>>, %arg8: memref<8x128xf32, #tpu.memory_space<vmem>>) attributes {dimension_semantics = [#tpu.dimension_semantics<parallel>, #tpu.dimension_semantics<arbitrary>], iteration_bounds = array<i64: 2, 1>, scalar_prefetch = 0 : i64, scratch_operands = 1 : i64, tpu.core_type = #tpu.core_type<tc>, window_params = [{transform_indices = @transform_0, window_bounds = array<i64: 8, 128>}, {transform_indices = @transform_1, window_bounds = array<i64: 128, 128>}, {transform_indices = @transform_2, window_bounds = array<i64: 1, 128>}, {transform_indices = @transform_3, window_bounds = array<i64: 128, 128>}, {pipeline_mode = #tpu.pipeline_mode<synchronous>, transform_indices = @transform_4, window_bounds = array<i64: 1, 128>}, {transform_indices = @transform_5, window_bounds = array<i64: 8, 128>}]} {
    %c0_i32 = arith.constant 0 : i32
    %0 = arith.cmpi eq, %arg1, %c0_i32 : i32
    %1 = arith.extui %0 : i1 to i32
    %c0_i32_0 = arith.constant 0 : i32
    %2 = arith.cmpi ne, %1, %c0_i32_0 : i32
    scf.if %2 {
      %c0_16 = arith.constant 0 : index
      %c0_17 = arith.constant 0 : index
      %19 = vector.load %arg6[%c0_16, %c0_17] : memref<1x128xf32, #tpu.memory_space<vmem>>, vector<1x128xf32>
      %20 = vector.shape_cast %19 : vector<1x128xf32> to vector<1x128xf32>
      %21 = vector.broadcast %20 : vector<1x128xf32> to vector<8x128xf32>
      %c0_18 = arith.constant 0 : index
      %c0_19 = arith.constant 0 : index
      %22 = vector.load %arg8[%c0_18, %c0_19] : memref<8x128xf32, #tpu.memory_space<vmem>>, vector<8x128xf32>
      tpu.vector_store %arg8[%c0_18, %c0_19], %21 {strides = array<i32>} : memref<8x128xf32, #tpu.memory_space<vmem>>, vector<8x128xf32>,
    } else {
    }
    %c0 = arith.constant 0 : index
    %c0_1 = arith.constant 0 : index
    %3 = vector.load %arg2[%c0, %c0_1] : memref<8x128xf32, #tpu.memory_space<vmem>>, vector<8x128xf32>
    %c0_2 = arith.constant 0 : index
    %c0_3 = arith.constant 0 : index
    %4 = vector.load %arg3[%c0_2, %c0_3] : memref<128x128xf32, #tpu.memory_space<vmem>>, vector<128x128xf32>
    %cst = arith.constant dense<0.000000e+00> : vector<8x128xf32>
    %5 = tpu.matmul %3, %4, %cst {dimension_numbers = #tpu.dot_dimension_numbers<[1], [0], [0], [1], [0, 0, 1, 1], [], []>} : vector<8x128xf32>, vector<128x128xf32>, vector<8x128xf32> -> vector<8x128xf32>
    %c0_4 = arith.constant 0 : index
    %c0_5 = arith.constant 0 : index
    %6 = vector.load %arg4[%c0_4, %c0_5] : memref<1x128xf32, #tpu.memory_space<vmem>>, vector<1x128xf32>
    %7 = vector.broadcast %6 : vector<1x128xf32> to vector<8x128xf32>
    %8 = arith.addf %5, %7 : vector<8x128xf32>
    %cst_6 = arith.constant 0.000000e+00 : f32
    %9 = vector.broadcast %cst_6 : f32 to vector<8x128xf32>
    %10 = arith.maximumf %8, %9 : vector<8x128xf32>
    %c0_7 = arith.constant 0 : index
    %c0_8 = arith.constant 0 : index
    %11 = vector.load %arg8[%c0_7, %c0_8] : memref<8x128xf32, #tpu.memory_space<vmem>>, vector<8x128xf32>
    %c0_9 = arith.constant 0 : index
    %c0_10 = arith.constant 0 : index
    %12 = vector.load %arg5[%c0_9, %c0_10] : memref<128x128xf32, #tpu.memory_space<vmem>>, vector<128x128xf32>
    %cst_11 = arith.constant dense<0.000000e+00> : vector<8x128xf32>
    %13 = tpu.matmul %10, %12, %cst_11 {dimension_numbers = #tpu.dot_dimension_numbers<[1], [0], [0], [1], [0, 0, 1, 1], [], []>} : vector<8x128xf32>, vector<128x128xf32>, vector<8x128xf32> -> vector<8x128xf32>
    %14 = arith.addf %11, %13 : vector<8x128xf32>
    %c0_12 = arith.constant 0 : index
    %c0_13 = arith.constant 0 : index
    %15 = vector.load %arg8[%c0_12, %c0_13] : memref<8x128xf32, #tpu.memory_space<vmem>>, vector<8x128xf32>
    tpu.vector_store %arg8[%c0_12, %c0_13], %14 {strides = array<i32>} : memref<8x128xf32, #tpu.memory_space<vmem>>, vector<8x128xf32>,
    %c0_i32_14 = arith.constant 0 : i32
    %16 = arith.cmpi eq, %arg1, %c0_i32_14 : i32
    %17 = arith.extui %16 : i1 to i32
    %c0_i32_15 = arith.constant 0 : i32
    %18 = arith.cmpi ne, %17, %c0_i32_15 : i32
    scf.if %18 {
      %c0_16 = arith.constant 0 : index
      %c0_17 = arith.constant 0 : index
      %19 = vector.load %arg8[%c0_16, %c0_17] : memref<8x128xf32, #tpu.memory_space<vmem>>, vector<8x128xf32>
      %c0_18 = arith.constant 0 : index
      %c0_19 = arith.constant 0 : index
      %20 = vector.load %arg7[%c0_18, %c0_19] : memref<8x128xf32, #tpu.memory_space<vmem>>, vector<8x128xf32>
      tpu.vector_store %arg7[%c0_18, %c0_19], %19 {strides = array<i32>} : memref<8x128xf32, #tpu.memory_space<vmem>>, vector<8x128xf32>,
    } else {
    }
    return
  }
  func.func @transform_0(%arg0: i32, %arg1: i32) -> (i32, i32) {
    %c0_i32 = arith.constant 0 : i32
    %c0_i32_0 = arith.constant 0 : i32
    return %arg0, %c0_i32 : i32, i32
  }
  func.func @transform_1(%arg0: i32, %arg1: i32) -> (i32, i32) {
    %c0_i32 = arith.constant 0 : i32
    %c0_i32_0 = arith.constant 0 : i32
    return %c0_i32, %arg1 : i32, i32
  }
  func.func @transform_2(%arg0: i32, %arg1: i32) -> (i32, i32) {
    %c0_i32 = arith.constant 0 : i32
    %c0_i32_0 = arith.constant 0 : i32
    return %c0_i32, %arg1 : i32, i32
  }
  func.func @transform_3(%arg0: i32, %arg1: i32) -> (i32, i32) {
    %c0_i32 = arith.constant 0 : i32
    %c0_i32_0 = arith.constant 0 : i32
    return %arg1, %c0_i32 : i32, i32
  }
  func.func @transform_4(%arg0: i32, %arg1: i32) -> (i32, i32) {
    %c0_i32 = arith.constant 0 : i32
    %c0_i32_0 = arith.constant 0 : i32
    %c0_i32_1 = arith.constant 0 : i32
    return %c0_i32, %c0_i32_0 : i32, i32
  }
  func.func @transform_5(%arg0: i32, %arg1: i32) -> (i32, i32) {
    %c0_i32 = arith.constant 0 : i32
    %c0_i32_0 = arith.constant 0 : i32
    return %arg0, %c0_i32 : i32, i32
  }
}

</mosaic_0001>

<bundles_post_ra>
// kernel: tpu_custom_call.1
= control target key start
LH: loop header
LB: loop body
LE: loop exit
PB: predicated region body
PF: predicated region fallthrough
CT: control target
= control target key end

     0   :  { %10 = vsyncpa [#allocation4], 0  ;;  %s1015_s0 = inlined_call_operand.hbm [shape: f32[16,128], index: 0, kind: input, shape index: {}]   ;;  %s1016_s1 = inlined_call_operand.hbm [shape: f32[128,128], index: 1, kind: input, shape index: {}]   ;;  %s1017_s2 = inlined_call_operand.vmem [shape: f32[1,128], index: 2, kind: input, shape index: {}]   ;;  %s1018_s3 = inlined_call_operand.hbm [shape: f32[128,128], index: 3, kind: input, shape index: {}]   ;;  %s1019_s4 = inlined_call_operand.vmem [shape: f32[1,128], index: 4, kind: input, shape index: {}]   ;;  %s1020_s5 = inlined_call_operand.hbm [shape: f32[16,128], index: 5, kind: output, shape index: {}]  }
   0x1   :  { %12 = vsyncpa [#allocation4 + $0x1], 0 }
   0x2   :  { %13 = vsyncpa [#allocation7], 0 }
   0x3   :  { %14 = vsyncpa [#allocation5], 0 }
   0x4   :  { %16 = vsyncpa [#allocation5 + $0x1], 0  ;;  %s858_s18 = smov 0   ;;  %s860_s19 = smov 0  }
   0x5   :  { %s862_s20 = smov 0   ;;  %s864_s21 = smov 0  }
   0x6   :  { %s866_s22 = smov 0   ;;  %s868_s23 = smov 0  }
   0x7 LB: > { %s541_s24 = sadd.s32 4294967295, %s822_s23   ;;  %p543_p0 = scmp.ge.s32.totalorder %s822_s23, 1  ;;  %s822_s23 = sphi %s868_s23, %s22_s23   ;;  %s818_s22 = sphi %s866_s22, %s1030_s22   ;;  %s814_s21 = sphi %s864_s21, %s1029_s21   ;;  %s810_s20 = sphi %s862_s20, %s1028_s20   ;;  %s806_s19 = sphi %s860_s19, %s1027_s19   ;;  %s802_s18 = sphi %s858_s18, %s1026_s18  }
   0x8   : > { %p892_p1 = scmp.eq.s32.totalorder %s541_s24, 0  ;;  %p190_p2 = scmp.lt.s32.totalorder %s822_s23, 3 }
   0x9   : > { %s203_s28 = sshll.u32 %s1016_s1, 4  ;;  %s824_s30 = smov [#allocation6]   ;;  %s204_s28 = int_to_ptr.hbm [resolvable:$true] %s203_s28 }
   0xa   : > { %p900_p3 = pnand %p543_p0, %p190_p2  ;;  %s205_s6 = sshll.u32 %s824_s30, 4  ;;  %s206_s6 = int_to_ptr.vmem [resolvable:$true] %s205_s6 }
   0xb   : > { %p547_p6 = scmp.ge.s32.totalorder %s822_s23, 2  ;;  %s226_s9 = sshll.u32 %s1018_s3, 4  ;;  %s227_s9 = int_to_ptr.hbm [resolvable:$true] %s226_s9 }
   0xc   : > { %p571_p4 = pneg %p900_p3  ;;  %s825_s10 = smov 128  }
   0xd   : > { %s826_s11 = smov 8   ;;  %s827_s12 = smov [#allocation8]  }
   0xe   : > { %p572_p5 = pnand %p571_p4, %p892_p1  ;;  %s228_s13 = sshll.u32 %s827_s12, 4  ;;  %s229_s13 = int_to_ptr.vmem [resolvable:$true] %s228_s13 }
   0xf   : > { %s34_s14 = sadd.s32 1, %s818_s22  ;;  %s542_s15 = sadd.s32 4294967294, %s822_s23  }
  0x10   : > { %574 = dma.hbm_to_vmem [thread:$0]  (!%p572_p5), %s204_s28, 2048, %s206_s6, [#allocation7], %s825_s10, %s825_s10, %s826_s11  }
  0x11   : > { %577 = dma.hbm_to_vmem [thread:$0]  (!%p572_p5), %s227_s9, 2048, %s229_s13, [#allocation7], %s825_s10, %s825_s10, %s826_s11  }
  0x12   : > { %p36_p7 = scmp.ge.s32.totalorder %s34_s14, 2  ;;  %s41_s16 = sadd.s32 1, %s810_s20 }
  0x13   : > { %p48_p8 = scmp.ne.s32.totalorder %s810_s20, %s806_s19  ;;  %p49_p9 = scmp.eq.s32.totalorder %s822_s23, 0 }
  0x14   : > { %s1032_s14 = smov (%p36_p7, %s34_s14), 0  ;;  %p54_p10 = scmp.ne.s32.totalorder %s806_s19, %s802_s18 }
  0x15   : > { %s38_s17 = ssub.s32 %s818_s22, %s1032_s14  ;;  %p177_p11 = scmp.eq.s32.totalorder %s541_s24, 1 }
  0x16   : > { %p39_p12 = scmp.eq.s32.totalorder %s38_s17, 0  ;;  %p928_p13 = por %p892_p1, %p54_p10 }
  0x17   : > { %p932_p0 = por %p177_p11, %p48_p8  ;;  %p183_p2 = scmp.eq.s32.totalorder %s542_s15, 1 }
  0x18   : > { %s937_s28 = scalar_select %p39_p12, %s810_s20, %s41_s16  }
  0x19   : > { %p50_p4 = por %p49_p9, %p48_p8  ;;  %p939_p5 = por %p183_p2, %p54_p10 }
  0x1a   : > { %s245_s6 = sand.u32 1, %s810_s20   ;;  %s549_s24 = sshll.u32 %s818_s22, 3 }
  0x1b   : > { %p588_p7 = scmp.lt.s32.totalorder %s822_s23, 2  ;;  %s548_s7 = sshll.u32 %s245_s6, 3 }
  0x1c   : > { %s253_s10 = scalar_lea.hbm %s1015_s0, %s549_s24  ;;  %s249_s12 = scalar_lea.vmem [#allocation3], %s548_s7 }
  0x1d   : > { %s255_s11 = sshll.u32 %s253_s10, 4  ;;  %s257_s13 = sshll.u32 %s249_s12, 4  ;;  %s256_s11 = int_to_ptr.hbm [resolvable:$true] %s255_s11  ;;  %s258_s13 = int_to_ptr.vmem [resolvable:$true] %s257_s13 }
  0x1e   : > { %p579_p11 = pnand %p588_p7, %p50_p4  ;;  %s246_s15 = scalar_lea.sflag [#allocation4], %s245_s6 }
  0x1f   : > { %266 = sbr.rel (%p900_p3) target bundleno = 332 (0x14c), region = 40  ;;  %s952_s16 = sand.u32 (!%p900_p3), 1, %s806_s19  }
  0x20   : > { %581 = dma.hbm_to_vmem [thread:$0]  (!%p579_p11), %s256_s11, 128, %s258_s13, %s246_s15  }
  0x21   : > { %s551_s17 = sshll.u32 (!%p900_p3), %s952_s16, 3  ;;  %s269_s24 = scalar_lea.sflag (!%p900_p3), [#allocation4], %s952_s16 }
  0x22   : > { %s958_s7 = scalar_lea.vmem (!%p900_p3), [#allocation3], %s551_s17 }
  0x24   : > { %789 = dma.done.wait (%p928_p13), %s269_s24, 128  }
  0x25   : > { %791 = vsyncadd (%p928_p13), %s269_s24, 4294967168 }
  0x26   : > { %793 = dma.done.wait (%p892_p1), [#allocation7], 4096  }
  0x27   : > { %795 = vsyncadd (%p892_p1), [#allocation7], 4294963200  ;;  %v342_v0 = vld [vmem:[#allocation6 + $0x78] sm:$0xff]  ;;  %v341_v1 = vld [vmem:[#allocation6 + $0x70] sm:$0xff]  ;;  %s556_s26 = sshll.u32 %s814_s21, 3  ;;  %s312_s12 = scalar_lea.vmem [#allocation9], %s551_s17 }
  0x28   : > { %347 = vmatpush.msra.mxu0 %v342_v0  ;;  %v340_v2 = vld [vmem:[#allocation6 + $0x68] sm:$0xff]  ;;  %v339_v3 = vld [vmem:[#allocation6 + $0x60] sm:$0xff]  ;;  %v384_v4 = vld [vmem:[#allocation8 + $0x78] sm:$0xff]  ;;  %s423_s9 = scalar_lea.hbm %s1020_s5, %s556_s26  ;;  %s425_s13 = sshll.u32 %s312_s12, 4  ;;  %s426_s13 = int_to_ptr.vmem [resolvable:$true] %s425_s13 }
  0x29   : > { %v338_v5 = vld [vmem:[#allocation6 + $0x58] sm:$0xff]  ;;  %385 = vmatpush.msra.mxu1 %v384_v4  ;;  %v383_v6 = vld [vmem:[#allocation8 + $0x70] sm:$0xff]  ;;  %v382_v7 = vld [vmem:[#allocation8 + $0x68] sm:$0xff]  ;;  %s427_s15 = sshll.u32 %s423_s9, 4  ;;  %s413_s24 = scalar_lea.sflag [#allocation5], %s952_s16  ;;  %s428_s15 = int_to_ptr.hbm [resolvable:$true] %s427_s15 }
  0x2a   : > { %348 = vmatpush.msra.mxu0 %v341_v1  ;;  %v337_v8 = vld [vmem:[#allocation6 + $0x50] sm:$0xff]  ;;  %v381_v9 = vld [vmem:[#allocation8 + $0x60] sm:$0xff]  ;;  %v336_v10 = vld [vmem:[#allocation6 + $0x48] sm:$0xff]  ;;  %s750_s21 = sshra.s32 %s428_s15, 4  ;;  %s756_s26 = scalar_lea.hbm %s1020_s5, 16  ;;  %s751_s21 = int_to_ptr.hbm [resolvable:$true] %s750_s21 }
  0x2b   : > { %386 = vmatpush.msra.mxu1 %v383_v6  ;;  %v380_v11 = vld [vmem:[#allocation8 + $0x58] sm:$0xff]  ;;  %v335_v12 = vld [vmem:[#allocation6 + $0x40] sm:$0xff]  ;;  %v379_v13 = vld [vmem:[#allocation8 + $0x50] sm:$0xff]  ;;  %p757_p9 = scmp.lt.s32.totalorder %s751_s21, %s1020_s5 }
  0x2c   : > { %349 = vmatpush.msra.mxu0 %v340_v2  ;;  %v334_v14 = vld [vmem:[#allocation6 + $0x38] sm:$0xff]  ;;  %v378_v15 = vld [vmem:[#allocation8 + $0x48] sm:$0xff]  ;;  %v333_v16 = vld [vmem:[#allocation6 + $0x30] sm:$0xff] }
  0x2d   : > { %387 = vmatpush.msra.mxu1 %v382_v7  ;;  %v377_v17 = vld [vmem:[#allocation8 + $0x40] sm:$0xff]  ;;  %v332_v18 = vld [vmem:[#allocation6 + $0x28] sm:$0xff]  ;;  %v376_v19 = vld [vmem:[#allocation8 + $0x38] sm:$0xff] }
  0x2e   : > { %350 = vmatpush.msra.mxu0 %v339_v3  ;;  %v331_v20 = vld [vmem:[#allocation6 + $0x20] sm:$0xff]  ;;  %v375_v21 = vld [vmem:[#allocation8 + $0x30] sm:$0xff]  ;;  %v330_v22 = vld [vmem:[#allocation6 + $0x18] sm:$0xff] }
  0x2f   : > { %388 = vmatpush.msra.mxu1 %v381_v9  ;;  %v374_v23 = vld [vmem:[#allocation8 + $0x28] sm:$0xff]  ;;  %v329_v24 = vld [vmem:[#allocation6 + $0x10] sm:$0xff]  ;;  %v373_v25 = vld [vmem:[#allocation8 + $0x20] sm:$0xff] }
  0x30   : > { %351 = vmatpush.msra.mxu0 %v338_v5  ;;  %v328_v26 = vld [vmem:[#allocation6 + $0x8] sm:$0xff]  ;;  %v372_v27 = vld [vmem:[#allocation8 + $0x18] sm:$0xff]  ;;  %v327_v28 = vld [vmem:[#allocation6] sm:$0xff] }
  0x31   : > { %389 = vmatpush.msra.mxu1 %v380_v11  ;;  %v326_v29 = vld [vmem:[%s958_s7] sm:$0xff]  ;;  %v370_v31 = vld [vmem:[#allocation8 + $0x8] sm:$0xff]  ;;  %v369_v32 = vld [vmem:[#allocation8] sm:$0xff]  ;;  %s752_s7 = scalar_lea.hbm %s751_s21, 8 }
  0x32   : > { %352 = vmatpush.msra.mxu0 %v337_v8  ;;  %v371_v30 = vld [vmem:[#allocation8 + $0x10] sm:$0xff]  ;;  %p753_p1 = scmp.ne.s32.totalorder %s751_s21, %s752_s7  ;;  %p758_p10 = scmp.lt.s32.totalorder %s756_s26, %s752_s7 }
  0x33   : > { %390 = vmatpush.msra.mxu1 %v379_v13  ;;  %v644_v33 = vld [vmem:[%s1017_s2] ss:$0 sm:$0xff] }
  0x34   : > { %353 = vmatpush.msra.mxu0 %v336_v10  ;;  %v645_v37 = vld [vmem:[%s1019_s4] ss:$0 sm:$0xff]  ;;  %p754_p3 = pnand %p753_p1, %p932_p0  ;;  %p759_p12 = por %p758_p10, %p757_p9 }
  0x35   : > { %391 = vmatpush.msra.mxu1 %v378_v15 }
  0x36   : > { %354 = vmatpush.msra.mxu0 %v335_v12  ;;  %p755_p8 = pneg %p754_p3 }
  0x37   : > { %392 = vmatpush.msra.mxu1 %v377_v17 }
  0x38   : > { %355 = vmatpush.msra.mxu0 %v334_v14  ;;  %p760_p13 = pnand %p759_p12, %p755_p8 }
  0x39   : > { %393 = vmatpush.msra.mxu1 %v376_v19 }
  0x3a   : > { %356 = vmatpush.msra.mxu0 %v333_v16 }
  0x3b   : > { %394 = vmatpush.msra.mxu1 %v375_v21 }
  0x3c   : > { %357 = vmatpush.msra.mxu0 %v332_v18 }
  0x3d   : > { %395 = vmatpush.msra.mxu1 %v374_v23 }
  0x3e   : > { %358 = vmatpush.msra.mxu0 %v331_v20 }
  0x3f   : > { %396 = vmatpush.msra.mxu1 %v373_v25 }
  0x40   : > { %359 = vmatpush.msra.mxu0 %v330_v22 }
  0x41   : > { %397 = vmatpush.msra.mxu1 %v372_v27 }
  0x42   : > { %360 = vmatpush.msra.mxu0 %v329_v24 }
  0x43   : > { %398 = vmatpush.msra.mxu1 %v371_v30 }
  0x44   : > { %361 = vmatpush.msra.mxu0 %v328_v26 }
  0x45   : > { %399 = vmatpush.msra.mxu1 %v370_v31 }
  0x46   : > { %362 = vmatpush.msra.mxu0 %v327_v28 }
  0x47   : > { %363 = vmatmul.f32.vlgmr.msra.gmra.mxu0 %v326_v29  ;;  %400 = vmatpush.msra.mxu1 %v369_v32 }
  0xc4   : > { %v364_v34 = vpop.f32.mrf.mxu0 }
  0xc5   : > { %v365_v35 = vadd.f32 %v644_v33, %v364_v34 }
  0xc7   : > { %v367_v36 = vmax.f32 %v365_v35, 0.0 }
  0xc9   : > { %401 = vmatmul.f32.vlgmr.msra.gmra.mxu1 %v367_v36 }
 0x146   : > { %v402_v38 = vpop.f32.mrf.mxu1 }
 0x147   : > { %v405_v39 = vadd.f32 %v645_v37, %v402_v38 }
 0x149   : > { %411 = vst [vmem:[%s312_s12] sm:$0xff] %v405_v39 }
 0x14a   : > { %763 = shalt.err (!%p760_p13)
}
 0x14b   : > { %569 = dma.vmem_to_hbm [thread:$0]  (%p932_p0), %s426_s13, 128, %s428_s15, %s413_s24  }
 0x14c PF: > { %s439_s16 = sand.u32 1, %s802_s18   ;;  %p583_p2 = pnand %p547_p6, %p939_p5 }
 0x14d   : > { %s440_s8 = scalar_lea.sflag [#allocation5], %s439_s16 }
 0x14e   : > { %p584_p4 = pneg %p583_p2 }
 0x150   : > { %797 = dma.done.wait (%p584_p4), %s440_s8, 128  }
 0x151   : > { %799 = vsyncadd (%p584_p4), %s440_s8, 4294967168  ;;  %s22_s23 = sadd.s32 1, %s822_s23   ;;  %s1026_s18 = smov %s806_s19 }
 0x152   : > { %p19_p7 = scmp.ge.s32.totalorder %s22_s23, 4   ;;  %s1027_s19 = smov %s810_s20 }
 0x153   : > { %s1028_s20 = smov %s937_s28  ;;  %s1029_s21 = smov %s818_s22 }
 0x154   : > { %s1030_s22 = smov %s1032_s14  ;;  %21 = sbr.rel (!%p19_p7) target bundleno = 7 (0x7), region = 106 }
 0x159   :  { %446 = vsyncpa [#allocation4], 1 }
 0x15a   :  { %448 = vsyncpa [#allocation4 + $0x1], 1 }
 0x15b   :  { %449 = vsyncpa [#allocation7], 1 }
 0x15c   :  { %450 = vsyncpa [#allocation5], 1 }
 0x15d   :  { %452 = vsyncpa [#allocation5 + $0x1], 1 }

</bundles_post_ra>
